<compile_context>
chip_gen: v5e
topology: v5e:2x2
jax: 0.10.0
libtpu: 0.0.40
codegen_flags: <defaults>
</compile_context>

<pallas_src>
import functools

import jax
import jax.numpy as jnp
from jax.experimental import pallas as pl
from jax.experimental.pallas import tpu as pltpu


def _round_up(x: int, m: int) -> int:
    return (x + m - 1) // m * m


# Minimum sublane tile (second-to-last block dim) per element size.
_SUBLANE = {4: 8, 2: 16, 1: 32}


def _apply_activation(h, activation, negative_slope):
    if activation == "relu":
        return jnp.maximum(h, 0.0)
    elif activation == "leaky_relu":
        return jnp.where(h > 0, h, negative_slope * h)
    else:
        raise ValueError("Activation function not supported")


def _mlp_kernel(*refs, n_linear, activation, negative_slope, use_sigmoid):
    """refs = (v_ref, t_ref, wv0, wt0, b0, w1, b1, ..., out_ref).

    Whole MLP hot path (matmuls + bias + activation + optional sigmoid) runs
    inside this single kernel on one batch tile.  All feature dims are padded
    to multiples of 128 by the wrapper, so intermediates and the output store
    are lane-dense.  Padded lanes carry zero weights/biases, so they stay
    zero through ReLU/LeakyReLU and never contaminate real outputs.
    """
    v_ref, t_ref = refs[0], refs[1]
    out_ref = refs[-1]
    params = refs[2:-1]

    # First layer: concat(v, t) @ W0 folded into two MXU calls.
    h = (
        jnp.dot(v_ref[...], params[0][...], preferred_element_type=jnp.float32)
        + jnp.dot(t_ref[...], params[1][...], preferred_element_type=jnp.float32)
        + params[2][...]  # bias stored as f32
    )
    # build_mlp always applies the activation right after the first Linear.
    h = _apply_activation(h, activation, negative_slope)

    for li in range(1, n_linear):
        w = params[3 + 2 * (li - 1)]
        b = params[3 + 2 * (li - 1) + 1]
        # Keep f32 accumulation; down-cast the LHS only when the weights are a
        # narrower dtype (bf16 path uses the full-rate bf16 MXU).
        # (Activating in f32 then casting keeps v5e's f32-only VPU happy.)
        lhs = h if w.dtype == jnp.float32 else h.astype(w.dtype)
        h = jnp.dot(lhs, w[...], preferred_element_type=jnp.float32) + b[...]
        if li < n_linear - 1:
            h = _apply_activation(h, activation, negative_slope)

    if use_sigmoid:
        h = jax.nn.sigmoid(h)
    out_ref[...] = h.astype(out_ref.dtype)


class AbstractViluPallas:
    """JAX/Pallas port of Abstractvilu with a concrete MLP forward."""

    def __init__(
        self,
        visual_dim: int = 512,
        textual_dim: int = 512,
        layers=(512, 256, 128, 1),
        activation: str = "relu",
        negative_slope: float = 0.01,
        use_sigmoid: bool = False,
        logit_scale: float = 100.0,
        key=None,
        dtype=jnp.bfloat16,          # bf16 hot path by default (f32 accumulate)
        block_batch: int = 512,      # batch tile target, multiple of 128
        single_buffer_weights: bool = True,
    ):
        if activation not in ("relu", "leaky_relu"):
            raise ValueError("Activation function not supported")

        self.visual_dim = visual_dim
        self.textual_dim = textual_dim
        self.layers = list(layers)
        self.activation = activation
        self.negative_slope = negative_slope
        self.use_sigmoid = use_sigmoid
        self.logit_scale = logit_scale  # unused (see TODO at top)
        self.dtype = dtype
        self.block_batch = block_batch
        self.single_buffer_weights = single_buffer_weights

        # Deterministic parameter init (synthetic, not a checkpoint load).
        if key is None:
            key = jax.random.PRNGKey(0)
        input_dim = visual_dim + textual_dim
        dims = [input_dim] + self.layers

        # Unpadded f32 params, used by the plain-JAX reference.
        self.params_ref = []  # list of (W (d_in, d_out), b (d_out,))
        for i in range(len(dims) - 1):
            key, wk, bk = jax.random.split(key, 3)
            bound = 1.0 / (dims[i] ** 0.5)
            w = jax.random.uniform(
                wk, (dims[i], dims[i + 1]), dtype=jnp.float32,
                minval=-bound, maxval=bound)
            b = jax.random.uniform(
                bk, (dims[i + 1],), dtype=jnp.float32,
                minval=-bound, maxval=bound)
            self.params_ref.append((w, b))

        # Kernel params: lane-dense (output dims padded to multiples of 128),
        # first-layer weight split into visual/textual halves, biases in f32.
        self.padded_dims = [_round_up(d, 128) for d in self.layers]
        kp = []
        w0, b0 = self.params_ref[0]
        d0, d0p = self.layers[0], self.padded_dims[0]
        wv = jnp.zeros((visual_dim, d0p), dtype).at[:, :d0].set(
            w0[:visual_dim].astype(dtype))
        wt = jnp.zeros((textual_dim, d0p), dtype).at[:, :d0].set(
            w0[visual_dim:].astype(dtype))
        b0p = jnp.zeros((1, d0p), jnp.float32).at[0, :d0].set(b0)
        kp += [wv, wt, b0p]
        for i in range(1, len(self.layers)):
            w, b = self.params_ref[i]
            din, dinp = self.layers[i - 1], self.padded_dims[i - 1]
            dout, doutp = self.layers[i], self.padded_dims[i]
            wp = jnp.zeros((dinp, doutp), dtype).at[:din, :dout].set(
                w.astype(dtype))
            bp = jnp.zeros((1, doutp), jnp.float32).at[0, :dout].set(b)
            kp += [wp, bp]
        self.kernel_params = kp

    # ------------------------------------------------------------------ #

    def _batch_tile(self, B: int) -> int:
        """Pick the batch tile: large (amortizes ~600-cycle step overhead,
        fills MXU rows), but >= 2 grid steps for B >= 256 so both v7x
        TensorCores get work, and sublane-legal for the storage dtype."""
        sub = _SUBLANE.get(jnp.dtype(self.dtype).itemsize, 8)
        cap = _round_up(max(self.block_batch, sub), sub)
        if B >= 256:
            cap = min(cap, _round_up(pl.cdiv(B, 2), 128))
        # A single full-extent tile is always layout-legal for tiny batches.
        return B if B <= cap else cap

    def __call__(self, v, t, return_padded: bool = False):
        v = v.astype(self.dtype)
        t = t.astype(self.dtype)
        B = v.shape[0]
        out_dim = self.layers[-1]
        out_pad = self.padded_dims[-1]
        n_linear = len(self.layers)

        TM = self._batch_tile(B)
        grid = (pl.cdiv(B, TM),)

        kernel = functools.partial(
            _mlp_kernel,
            n_linear=n_linear,
            activation=self.activation,
            negative_slope=self.negative_slope,
            use_sigmoid=self.use_sigmoid,
        )

        in_itemsize = jnp.dtype(self.dtype).itemsize
        param_bytes = sum(int(p.size) * p.dtype.itemsize
                          for p in self.kernel_params)

        # Explicit scoped-VMEM budget: double-buffered v/t/out tiles +
        # (worst-case double-buffered) resident weights + f32 intermediates,
        # with 2x headroom; clamped to stay below v7x's 64 MiB physical VMEM.
        est_vmem = (
            2 * TM * (self.visual_dim + self.textual_dim) * in_itemsize
            + 2 * TM * out_pad * in_itemsize
            + 2 * param_bytes
            + 2 * TM * max(self.padded_dims) * 4
        )
        vmem_limit = int(min(max(2 * est_vmem, 32 << 20), 60 << 20))

        # Advisory cost estimate for the XLA scheduler.
        flops = 2 * B * (self.visual_dim + self.textual_dim) * self.padded_dims[0]
        for i in range(1, n_linear):
            flops += 2 * B * self.padded_dims[i - 1] * self.padded_dims[i]
        bytes_accessed = (
            B * (self.visual_dim + self.textual_dim) * in_itemsize
            + param_bytes
            + B * out_pad * in_itemsize
        )
        cost = pl.CostEstimate(
            flops=int(flops),
            transcendentals=int(B * out_pad) if self.use_sigmoid else 0,
            bytes_accessed=int(bytes_accessed),
        )

        def build(single_buffer_weights: bool):
            # v/t are tiled over the batch; all weights/biases are full-extent
            # blocks (VMEM-resident across the whole grid).
            in_specs = [
                pl.BlockSpec((TM, self.visual_dim), lambda i: (i, 0)),
                pl.BlockSpec((TM, self.textual_dim), lambda i: (i, 0)),
            ]
            wkwargs = (
                dict(pipeline_mode=pl.Buffered(1))  # constant index -> 1 buffer
                if single_buffer_weights else {}
            )
            for p in self.kernel_params:
                in_specs.append(pl.BlockSpec(p.shape, lambda i: (0, 0), **wkwargs))
            out_specs = pl.BlockSpec((TM, out_pad), lambda i: (i, 0))
            return pl.pallas_call(
                kernel,
                out_shape=jax.ShapeDtypeStruct((B, out_pad), self.dtype),
                grid_spec=pltpu.PrefetchScalarGridSpec(
                    num_scalar_prefetch=0,
                    grid=grid,
                    in_specs=in_specs,
                    out_specs=out_specs,
                ),
                compiler_params=pltpu.CompilerParams(
                    dimension_semantics=("parallel",),
                    vmem_limit_bytes=vmem_limit,
                ),
                cost_estimate=cost,
            )

        if self.single_buffer_weights:
            try:
                out_padded = build(True)(v, t, *self.kernel_params)
            except Exception:
                # TODO(synk): pl.Buffered(1) single-buffering of constant-index
                # weight blocks is a newer Pallas feature; fall back to the
                # default (double-buffered) specs if this jax build rejects it.
                out_padded = build(False)(v, t, *self.kernel_params)
        else:
            out_padded = build(False)(v, t, *self.kernel_params)

        # Padded rows of a partial last tile hold garbage in-kernel but are
        # clipped on writeback (nothing reduces over the batch axis).
        if out_dim == out_pad or return_padded:
            return out_padded
        # Lane-padding is trimmed outside the kernel; pass return_padded=True
        # (or fuse this slice into the consumer) to avoid the extra HBM pass.
        return out_padded[:, :out_dim]

    # ------------------------------------------------------------------ #

    def reference(self, v, t):
        """Plain-JAX reference matching build_mlp semantics.

        Uses the same dtype-quantized weights the kernel stores (then f32
        math), so the comparison isolates kernel error from weight rounding.
        """
        h = jnp.concatenate([v, t], axis=-1).astype(jnp.float32)
        n = len(self.params_ref)
        for li, (w, b) in enumerate(self.params_ref):
            wq = w.astype(self.dtype).astype(jnp.float32)
            h = h @ wq + b
            # build_mlp: activation after the first Linear (always) and after
            # every Linear except the last.
            if li == 0 or li < n - 1:
                h = _apply_activation(h, self.activation, self.negative_slope)
        if self.use_sigmoid:
            h = jax.nn.sigmoid(h)
        return h


if __name__ == "__main__":
    key = jax.random.PRNGKey(0)

    # --- Config A: f32, relu, no sigmoid, single grid step ------------------
    kv, kt, kp, key = jax.random.split(key, 4)
    batch, vdim, tdim = 8, 32, 32
    layers_a = [64, 32, 16, 1]
    va = jax.random.normal(kv, (batch, vdim), dtype=jnp.float32)
    ta = jax.random.normal(kt, (batch, tdim), dtype=jnp.float32)
    model_a = AbstractViluPallas(
        visual_dim=vdim, textual_dim=tdim, layers=layers_a,
        activation="relu", use_sigmoid=False, key=kp, dtype=jnp.float32)
    out_a = jax.block_until_ready(model_a(va, ta))
    ref_a = model_a.reference(va, ta)
    assert out_a.shape == (batch, layers_a[-1])
    assert jnp.allclose(out_a.astype(jnp.float32), ref_a, atol=1e-4, rtol=1e-4)

    # --- Config B: bf16 default, leaky_relu + sigmoid, 3-step grid w/ tail --
    kv, kt, kp, key = jax.random.split(key, 4)
    batch_b = 40
    layers_b = [48, 24, 3]
    vb = jax.random.normal(kv, (batch_b, vdim), jnp.float32).astype(jnp.bfloat16)
    tb = jax.random.normal(kt, (batch_b, tdim), jnp.float32).astype(jnp.bfloat16)
    model_b = AbstractViluPallas(
        visual_dim=vdim, textual_dim=tdim, layers=layers_b,
        activation="leaky_relu", negative_slope=0.01, use_sigmoid=True,
        key=kp, block_batch=16)  # small tile -> grid of 3 with padded tail
    out_b = jax.block_until_ready(model_b(vb, tb))
    ref_b = model_b.reference(vb, tb)
    assert out_b.shape == (batch_b, layers_b[-1])
    assert jnp.allclose(out_b.astype(jnp.float32), ref_b, atol=2e-2, rtol=2e-2)

    # --- Config C: degenerate single-Linear MLP (activation after it) -------
    kv, kt, kp, key = jax.random.split(key, 4)
    vc = jax.random.normal(kv, (4, vdim), jnp.float32)
    tc = jax.random.normal(kt, (4, tdim), jnp.float32)
    model_c = AbstractViluPallas(
        visual_dim=vdim, textual_dim=tdim, layers=[16],
        activation="relu", use_sigmoid=False, key=kp, dtype=jnp.float32)
    out_c = jax.block_until_ready(model_c(vc, tc))
    ref_c = model_c.reference(vc, tc)
    assert out_c.shape == (4, 16)
    assert jnp.allclose(out_c.astype(jnp.float32), ref_c, atol=1e-4, rtol=1e-4)

    # --- Config D: bf16, B>=256 -> 2-step batch grid (both v7x TCs used) ----
    kv, kt, kp, key = jax.random.split(key, 4)
    batch_d = 384
    vd = jax.random.normal(kv, (batch_d, vdim), jnp.float32).astype(jnp.bfloat16)
    td = jax.random.normal(kt, (batch_d, tdim), jnp.float32).astype(jnp.bfloat16)
    model_d = AbstractViluPallas(
        visual_dim=vdim, textual_dim=tdim, layers=[64, 32, 4],
        activation="relu", use_sigmoid=False, key=kp)
    out_d = jax.block_until_ready(model_d(vd, td))
    ref_d = model_d.reference(vd, td)
    assert out_d.shape == (batch_d, 4)
    assert jnp.allclose(out_d.astype(jnp.float32), ref_d, atol=2e-2, rtol=2e-2)

    print("KERNEL_OK")
</pallas_src>

<mosaic_0001>
module attributes {stable_mosaic.version = 11 : i64} {
  func.func @_mlp_kernel(%arg0: i32, %arg1: memref<8x32xf32, #tpu.memory_space<vmem>>, %arg2: memref<8x32xf32, #tpu.memory_space<vmem>>, %arg3: memref<32x128xf32, #tpu.memory_space<vmem>>, %arg4: memref<32x128xf32, #tpu.memory_space<vmem>>, %arg5: memref<1x128xf32, #tpu.memory_space<vmem>>, %arg6: memref<128x128xf32, #tpu.memory_space<vmem>>, %arg7: memref<1x128xf32, #tpu.memory_space<vmem>>, %arg8: memref<128x128xf32, #tpu.memory_space<vmem>>, %arg9: memref<1x128xf32, #tpu.memory_space<vmem>>, %arg10: memref<128x128xf32, #tpu.memory_space<vmem>>, %arg11: memref<1x128xf32, #tpu.memory_space<vmem>>, %arg12: memref<8x128xf32, #tpu.memory_space<vmem>>) attributes {dimension_semantics = [#tpu.dimension_semantics<parallel>], iteration_bounds = array<i64: 1>, scalar_prefetch = 0 : i64, scratch_operands = 0 : i64, tpu.core_type = #tpu.core_type<tc>, window_params = [{transform_indices = @transform_0, window_bounds = array<i64: 8, 32>}, {transform_indices = @transform_1, window_bounds = array<i64: 8, 32>}, {pipeline_mode = #tpu.pipeline_mode<synchronous>, transform_indices = @transform_2, window_bounds = array<i64: 32, 128>}, {pipeline_mode = #tpu.pipeline_mode<synchronous>, transform_indices = @transform_3, window_bounds = array<i64: 32, 128>}, {pipeline_mode = #tpu.pipeline_mode<synchronous>, transform_indices = @transform_4, window_bounds = array<i64: 1, 128>}, {pipeline_mode = #tpu.pipeline_mode<synchronous>, transform_indices = @transform_5, window_bounds = array<i64: 128, 128>}, {pipeline_mode = #tpu.pipeline_mode<synchronous>, transform_indices = @transform_6, window_bounds = array<i64: 1, 128>}, {pipeline_mode = #tpu.pipeline_mode<synchronous>, transform_indices = @transform_7, window_bounds = array<i64: 128, 128>}, {pipeline_mode = #tpu.pipeline_mode<synchronous>, transform_indices = @transform_8, window_bounds = array<i64: 1, 128>}, {pipeline_mode = #tpu.pipeline_mode<synchronous>, transform_indices = @transform_9, window_bounds = array<i64: 128, 128>}, {pipeline_mode = #tpu.pipeline_mode<synchronous>, transform_indices = @transform_10, window_bounds = array<i64: 1, 128>}, {transform_indices = @transform_11, window_bounds = array<i64: 8, 128>}]} {
    %c0 = arith.constant 0 : index
    %c0_0 = arith.constant 0 : index
    %0 = vector.load %arg1[%c0, %c0_0] : memref<8x32xf32, #tpu.memory_space<vmem>>, vector<8x32xf32>
    %c0_1 = arith.constant 0 : index
    %c0_2 = arith.constant 0 : index
    %1 = vector.load %arg3[%c0_1, %c0_2] : memref<32x128xf32, #tpu.memory_space<vmem>>, vector<32x128xf32>
    %cst = arith.constant dense<0.000000e+00> : vector<8x128xf32>
    %2 = tpu.matmul %0, %1, %cst {dimension_numbers = #tpu.dot_dimension_numbers<[1], [0], [0], [1], [0, 0, 1, 1], [], []>} : vector<8x32xf32>, vector<32x128xf32>, vector<8x128xf32> -> vector<8x128xf32>
    %c0_3 = arith.constant 0 : index
    %c0_4 = arith.constant 0 : index
    %3 = vector.load %arg2[%c0_3, %c0_4] : memref<8x32xf32, #tpu.memory_space<vmem>>, vector<8x32xf32>
    %c0_5 = arith.constant 0 : index
    %c0_6 = arith.constant 0 : index
    %4 = vector.load %arg4[%c0_5, %c0_6] : memref<32x128xf32, #tpu.memory_space<vmem>>, vector<32x128xf32>
    %cst_7 = arith.constant dense<0.000000e+00> : vector<8x128xf32>
    %5 = tpu.matmul %3, %4, %cst_7 {dimension_numbers = #tpu.dot_dimension_numbers<[1], [0], [0], [1], [0, 0, 1, 1], [], []>} : vector<8x32xf32>, vector<32x128xf32>, vector<8x128xf32> -> vector<8x128xf32>
    %6 = arith.addf %2, %5 : vector<8x128xf32>
    %c0_8 = arith.constant 0 : index
    %c0_9 = arith.constant 0 : index
    %7 = vector.load %arg5[%c0_8, %c0_9] : memref<1x128xf32, #tpu.memory_space<vmem>>, vector<1x128xf32>
    %8 = vector.broadcast %7 : vector<1x128xf32> to vector<8x128xf32>
    %9 = arith.addf %6, %8 : vector<8x128xf32>
    %cst_10 = arith.constant 0.000000e+00 : f32
    %10 = vector.broadcast %cst_10 : f32 to vector<8x128xf32>
    %11 = arith.maximumf %9, %10 : vector<8x128xf32>
    %c0_11 = arith.constant 0 : index
    %c0_12 = arith.constant 0 : index
    %12 = vector.load %arg6[%c0_11, %c0_12] : memref<128x128xf32, #tpu.memory_space<vmem>>, vector<128x128xf32>
    %cst_13 = arith.constant dense<0.000000e+00> : vector<8x128xf32>
    %13 = tpu.matmul %11, %12, %cst_13 {dimension_numbers = #tpu.dot_dimension_numbers<[1], [0], [0], [1], [0, 0, 1, 1], [], []>} : vector<8x128xf32>, vector<128x128xf32>, vector<8x128xf32> -> vector<8x128xf32>
    %c0_14 = arith.constant 0 : index
    %c0_15 = arith.constant 0 : index
    %14 = vector.load %arg7[%c0_14, %c0_15] : memref<1x128xf32, #tpu.memory_space<vmem>>, vector<1x128xf32>
    %15 = vector.broadcast %14 : vector<1x128xf32> to vector<8x128xf32>
    %16 = arith.addf %13, %15 : vector<8x128xf32>
    %cst_16 = arith.constant 0.000000e+00 : f32
    %17 = vector.broadcast %cst_16 : f32 to vector<8x128xf32>
    %18 = arith.maximumf %16, %17 : vector<8x128xf32>
    %c0_17 = arith.constant 0 : index
    %c0_18 = arith.constant 0 : index
    %19 = vector.load %arg8[%c0_17, %c0_18] : memref<128x128xf32, #tpu.memory_space<vmem>>, vector<128x128xf32>
    %cst_19 = arith.constant dense<0.000000e+00> : vector<8x128xf32>
    %20 = tpu.matmul %18, %19, %cst_19 {dimension_numbers = #tpu.dot_dimension_numbers<[1], [0], [0], [1], [0, 0, 1, 1], [], []>} : vector<8x128xf32>, vector<128x128xf32>, vector<8x128xf32> -> vector<8x128xf32>
    %c0_20 = arith.constant 0 : index
    %c0_21 = arith.constant 0 : index
    %21 = vector.load %arg9[%c0_20, %c0_21] : memref<1x128xf32, #tpu.memory_space<vmem>>, vector<1x128xf32>
    %22 = vector.broadcast %21 : vector<1x128xf32> to vector<8x128xf32>
    %23 = arith.addf %20, %22 : vector<8x128xf32>
    %cst_22 = arith.constant 0.000000e+00 : f32
    %24 = vector.broadcast %cst_22 : f32 to vector<8x128xf32>
    %25 = arith.maximumf %23, %24 : vector<8x128xf32>
    %c0_23 = arith.constant 0 : index
    %c0_24 = arith.constant 0 : index
    %26 = vector.load %arg10[%c0_23, %c0_24] : memref<128x128xf32, #tpu.memory_space<vmem>>, vector<128x128xf32>
    %cst_25 = arith.constant dense<0.000000e+00> : vector<8x128xf32>
    %27 = tpu.matmul %25, %26, %cst_25 {dimension_numbers = #tpu.dot_dimension_numbers<[1], [0], [0], [1], [0, 0, 1, 1], [], []>} : vector<8x128xf32>, vector<128x128xf32>, vector<8x128xf32> -> vector<8x128xf32>
    %c0_26 = arith.constant 0 : index
    %c0_27 = arith.constant 0 : index
    %28 = vector.load %arg11[%c0_26, %c0_27] : memref<1x128xf32, #tpu.memory_space<vmem>>, vector<1x128xf32>
    %29 = vector.broadcast %28 : vector<1x128xf32> to vector<8x128xf32>
    %30 = arith.addf %27, %29 : vector<8x128xf32>
    %c0_28 = arith.constant 0 : index
    %c0_29 = arith.constant 0 : index
    %31 = vector.load %arg12[%c0_28, %c0_29] : memref<8x128xf32, #tpu.memory_space<vmem>>, vector<8x128xf32>
    tpu.vector_store %arg12[%c0_28, %c0_29], %30 {strides = array<i32>} : memref<8x128xf32, #tpu.memory_space<vmem>>, vector<8x128xf32>,
    return
  }
  func.func @transform_0(%arg0: i32) -> (i32, i32) {
    %c0_i32 = arith.constant 0 : i32
    %c0_i32_0 = arith.constant 0 : i32
    return %arg0, %c0_i32 : i32, i32
  }
  func.func @transform_1(%arg0: i32) -> (i32, i32) {
    %c0_i32 = arith.constant 0 : i32
    %c0_i32_0 = arith.constant 0 : i32
    return %arg0, %c0_i32 : i32, i32
  }
  func.func @transform_2(%arg0: i32) -> (i32, i32) {
    %c0_i32 = arith.constant 0 : i32
    %c0_i32_0 = arith.constant 0 : i32
    %c0_i32_1 = arith.constant 0 : i32
    return %c0_i32, %c0_i32_0 : i32, i32
  }
  func.func @transform_3(%arg0: i32) -> (i32, i32) {
    %c0_i32 = arith.constant 0 : i32
    %c0_i32_0 = arith.constant 0 : i32
    %c0_i32_1 = arith.constant 0 : i32
    return %c0_i32, %c0_i32_0 : i32, i32
  }
  func.func @transform_4(%arg0: i32) -> (i32, i32) {
    %c0_i32 = arith.constant 0 : i32
    %c0_i32_0 = arith.constant 0 : i32
    %c0_i32_1 = arith.constant 0 : i32
    return %c0_i32, %c0_i32_0 : i32, i32
  }
  func.func @transform_5(%arg0: i32) -> (i32, i32) {
    %c0_i32 = arith.constant 0 : i32
    %c0_i32_0 = arith.constant 0 : i32
    %c0_i32_1 = arith.constant 0 : i32
    return %c0_i32, %c0_i32_0 : i32, i32
  }
  func.func @transform_6(%arg0: i32) -> (i32, i32) {
    %c0_i32 = arith.constant 0 : i32
    %c0_i32_0 = arith.constant 0 : i32
    %c0_i32_1 = arith.constant 0 : i32
    return %c0_i32, %c0_i32_0 : i32, i32
  }
  func.func @transform_7(%arg0: i32) -> (i32, i32) {
    %c0_i32 = arith.constant 0 : i32
    %c0_i32_0 = arith.constant 0 : i32
    %c0_i32_1 = arith.constant 0 : i32
    return %c0_i32, %c0_i32_0 : i32, i32
  }
  func.func @transform_8(%arg0: i32) -> (i32, i32) {
    %c0_i32 = arith.constant 0 : i32
    %c0_i32_0 = arith.constant 0 : i32
    %c0_i32_1 = arith.constant 0 : i32
    return %c0_i32, %c0_i32_0 : i32, i32
  }
  func.func @transform_9(%arg0: i32) -> (i32, i32) {
    %c0_i32 = arith.constant 0 : i32
    %c0_i32_0 = arith.constant 0 : i32
    %c0_i32_1 = arith.constant 0 : i32
    return %c0_i32, %c0_i32_0 : i32, i32
  }
  func.func @transform_10(%arg0: i32) -> (i32, i32) {
    %c0_i32 = arith.constant 0 : i32
    %c0_i32_0 = arith.constant 0 : i32
    %c0_i32_1 = arith.constant 0 : i32
    return %c0_i32, %c0_i32_0 : i32, i32
  }
  func.func @transform_11(%arg0: i32) -> (i32, i32) {
    %c0_i32 = arith.constant 0 : i32
    %c0_i32_0 = arith.constant 0 : i32
    return %arg0, %c0_i32 : i32, i32
  }
}

module attributes {stable_mosaic.version = 11 : i64} {
  func.func @_mlp_kernel(%arg0: i32, %arg1: memref<8x32xf32, #tpu.memory_space<vmem>>, %arg2: memref<8x32xf32, #tpu.memory_space<vmem>>, %arg3: memref<32x128xf32, #tpu.memory_space<vmem>>, %arg4: memref<32x128xf32, #tpu.memory_space<vmem>>, %arg5: memref<1x128xf32, #tpu.memory_space<vmem>>, %arg6: memref<128x128xf32, #tpu.memory_space<vmem>>, %arg7: memref<1x128xf32, #tpu.memory_space<vmem>>, %arg8: memref<128x128xf32, #tpu.memory_space<vmem>>, %arg9: memref<1x128xf32, #tpu.memory_space<vmem>>, %arg10: memref<128x128xf32, #tpu.memory_space<vmem>>, %arg11: memref<1x128xf32, #tpu.memory_space<vmem>>, %arg12: memref<8x128xf32, #tpu.memory_space<vmem>>) attributes {dimension_semantics = [#tpu.dimension_semantics<parallel>], iteration_bounds = array<i64: 1>, scalar_prefetch = 0 : i64, scratch_operands = 0 : i64, tpu.core_type = #tpu.core_type<tc>, window_params = [{transform_indices = @transform_0, window_bounds = array<i64: 8, 32>}, {transform_indices = @transform_1, window_bounds = array<i64: 8, 32>}, {pipeline_mode = #tpu.pipeline_mode<synchronous>, transform_indices = @transform_2, window_bounds = array<i64: 32, 128>}, {pipeline_mode = #tpu.pipeline_mode<synchronous>, transform_indices = @transform_3, window_bounds = array<i64: 32, 128>}, {pipeline_mode = #tpu.pipeline_mode<synchronous>, transform_indices = @transform_4, window_bounds = array<i64: 1, 128>}, {pipeline_mode = #tpu.pipeline_mode<synchronous>, transform_indices = @transform_5, window_bounds = array<i64: 128, 128>}, {pipeline_mode = #tpu.pipeline_mode<synchronous>, transform_indices = @transform_6, window_bounds = array<i64: 1, 128>}, {pipeline_mode = #tpu.pipeline_mode<synchronous>, transform_indices = @transform_7, window_bounds = array<i64: 128, 128>}, {pipeline_mode = #tpu.pipeline_mode<synchronous>, transform_indices = @transform_8, window_bounds = array<i64: 1, 128>}, {pipeline_mode = #tpu.pipeline_mode<synchronous>, transform_indices = @transform_9, window_bounds = array<i64: 128, 128>}, {pipeline_mode = #tpu.pipeline_mode<synchronous>, transform_indices = @transform_10, window_bounds = array<i64: 1, 128>}, {transform_indices = @transform_11, window_bounds = array<i64: 8, 128>}]} {
    %c0 = arith.constant 0 : index
    %c0_0 = arith.constant 0 : index
    %0 = vector.load %arg1[%c0, %c0_0] : memref<8x32xf32, #tpu.memory_space<vmem>>, vector<8x32xf32>
    %c0_1 = arith.constant 0 : index
    %c0_2 = arith.constant 0 : index
    %1 = vector.load %arg3[%c0_1, %c0_2] : memref<32x128xf32, #tpu.memory_space<vmem>>, vector<32x128xf32>
    %cst = arith.constant dense<0.000000e+00> : vector<8x128xf32>
    %2 = tpu.matmul %0, %1, %cst {dimension_numbers = #tpu.dot_dimension_numbers<[1], [0], [0], [1], [0, 0, 1, 1], [], []>} : vector<8x32xf32>, vector<32x128xf32>, vector<8x128xf32> -> vector<8x128xf32>
    %c0_3 = arith.constant 0 : index
    %c0_4 = arith.constant 0 : index
    %3 = vector.load %arg2[%c0_3, %c0_4] : memref<8x32xf32, #tpu.memory_space<vmem>>, vector<8x32xf32>
    %c0_5 = arith.constant 0 : index
    %c0_6 = arith.constant 0 : index
    %4 = vector.load %arg4[%c0_5, %c0_6] : memref<32x128xf32, #tpu.memory_space<vmem>>, vector<32x128xf32>
    %cst_7 = arith.constant dense<0.000000e+00> : vector<8x128xf32>
    %5 = tpu.matmul %3, %4, %cst_7 {dimension_numbers = #tpu.dot_dimension_numbers<[1], [0], [0], [1], [0, 0, 1, 1], [], []>} : vector<8x32xf32>, vector<32x128xf32>, vector<8x128xf32> -> vector<8x128xf32>
    %6 = arith.addf %2, %5 : vector<8x128xf32>
    %c0_8 = arith.constant 0 : index
    %c0_9 = arith.constant 0 : index
    %7 = vector.load %arg5[%c0_8, %c0_9] : memref<1x128xf32, #tpu.memory_space<vmem>>, vector<1x128xf32>
    %8 = vector.broadcast %7 : vector<1x128xf32> to vector<8x128xf32>
    %9 = arith.addf %6, %8 : vector<8x128xf32>
    %cst_10 = arith.constant 0.000000e+00 : f32
    %10 = vector.broadcast %cst_10 : f32 to vector<8x128xf32>
    %11 = arith.maximumf %9, %10 : vector<8x128xf32>
    %c0_11 = arith.constant 0 : index
    %c0_12 = arith.constant 0 : index
    %12 = vector.load %arg6[%c0_11, %c0_12] : memref<128x128xf32, #tpu.memory_space<vmem>>, vector<128x128xf32>
    %cst_13 = arith.constant dense<0.000000e+00> : vector<8x128xf32>
    %13 = tpu.matmul %11, %12, %cst_13 {dimension_numbers = #tpu.dot_dimension_numbers<[1], [0], [0], [1], [0, 0, 1, 1], [], []>} : vector<8x128xf32>, vector<128x128xf32>, vector<8x128xf32> -> vector<8x128xf32>
    %c0_14 = arith.constant 0 : index
    %c0_15 = arith.constant 0 : index
    %14 = vector.load %arg7[%c0_14, %c0_15] : memref<1x128xf32, #tpu.memory_space<vmem>>, vector<1x128xf32>
    %15 = vector.broadcast %14 : vector<1x128xf32> to vector<8x128xf32>
    %16 = arith.addf %13, %15 : vector<8x128xf32>
    %cst_16 = arith.constant 0.000000e+00 : f32
    %17 = vector.broadcast %cst_16 : f32 to vector<8x128xf32>
    %18 = arith.maximumf %16, %17 : vector<8x128xf32>
    %c0_17 = arith.constant 0 : index
    %c0_18 = arith.constant 0 : index
    %19 = vector.load %arg8[%c0_17, %c0_18] : memref<128x128xf32, #tpu.memory_space<vmem>>, vector<128x128xf32>
    %cst_19 = arith.constant dense<0.000000e+00> : vector<8x128xf32>
    %20 = tpu.matmul %18, %19, %cst_19 {dimension_numbers = #tpu.dot_dimension_numbers<[1], [0], [0], [1], [0, 0, 1, 1], [], []>} : vector<8x128xf32>, vector<128x128xf32>, vector<8x128xf32> -> vector<8x128xf32>
    %c0_20 = arith.constant 0 : index
    %c0_21 = arith.constant 0 : index
    %21 = vector.load %arg9[%c0_20, %c0_21] : memref<1x128xf32, #tpu.memory_space<vmem>>, vector<1x128xf32>
    %22 = vector.broadcast %21 : vector<1x128xf32> to vector<8x128xf32>
    %23 = arith.addf %20, %22 : vector<8x128xf32>
    %cst_22 = arith.constant 0.000000e+00 : f32
    %24 = vector.broadcast %cst_22 : f32 to vector<8x128xf32>
    %25 = arith.maximumf %23, %24 : vector<8x128xf32>
    %c0_23 = arith.constant 0 : index
    %c0_24 = arith.constant 0 : index
    %26 = vector.load %arg10[%c0_23, %c0_24] : memref<128x128xf32, #tpu.memory_space<vmem>>, vector<128x128xf32>
    %cst_25 = arith.constant dense<0.000000e+00> : vector<8x128xf32>
    %27 = tpu.matmul %25, %26, %cst_25 {dimension_numbers = #tpu.dot_dimension_numbers<[1], [0], [0], [1], [0, 0, 1, 1], [], []>} : vector<8x128xf32>, vector<128x128xf32>, vector<8x128xf32> -> vector<8x128xf32>
    %c0_26 = arith.constant 0 : index
    %c0_27 = arith.constant 0 : index
    %28 = vector.load %arg11[%c0_26, %c0_27] : memref<1x128xf32, #tpu.memory_space<vmem>>, vector<1x128xf32>
    %29 = vector.broadcast %28 : vector<1x128xf32> to vector<8x128xf32>
    %30 = arith.addf %27, %29 : vector<8x128xf32>
    %c0_28 = arith.constant 0 : index
    %c0_29 = arith.constant 0 : index
    %31 = vector.load %arg12[%c0_28, %c0_29] : memref<8x128xf32, #tpu.memory_space<vmem>>, vector<8x128xf32>
    tpu.vector_store %arg12[%c0_28, %c0_29], %30 {strides = array<i32>} : memref<8x128xf32, #tpu.memory_space<vmem>>, vector<8x128xf32>,
    return
  }
  func.func @transform_0(%arg0: i32) -> (i32, i32) {
    %c0_i32 = arith.constant 0 : i32
    %c0_i32_0 = arith.constant 0 : i32
    return %arg0, %c0_i32 : i32, i32
  }
  func.func @transform_1(%arg0: i32) -> (i32, i32) {
    %c0_i32 = arith.constant 0 : i32
    %c0_i32_0 = arith.constant 0 : i32
    return %arg0, %c0_i32 : i32, i32
  }
  func.func @transform_2(%arg0: i32) -> (i32, i32) {
    %c0_i32 = arith.constant 0 : i32
    %c0_i32_0 = arith.constant 0 : i32
    %c0_i32_1 = arith.constant 0 : i32
    return %c0_i32, %c0_i32_0 : i32, i32
  }
  func.func @transform_3(%arg0: i32) -> (i32, i32) {
    %c0_i32 = arith.constant 0 : i32
    %c0_i32_0 = arith.constant 0 : i32
    %c0_i32_1 = arith.constant 0 : i32
    return %c0_i32, %c0_i32_0 : i32, i32
  }
  func.func @transform_4(%arg0: i32) -> (i32, i32) {
    %c0_i32 = arith.constant 0 : i32
    %c0_i32_0 = arith.constant 0 : i32
    %c0_i32_1 = arith.constant 0 : i32
    return %c0_i32, %c0_i32_0 : i32, i32
  }
  func.func @transform_5(%arg0: i32) -> (i32, i32) {
    %c0_i32 = arith.constant 0 : i32
    %c0_i32_0 = arith.constant 0 : i32
    %c0_i32_1 = arith.constant 0 : i32
    return %c0_i32, %c0_i32_0 : i32, i32
  }
  func.func @transform_6(%arg0: i32) -> (i32, i32) {
    %c0_i32 = arith.constant 0 : i32
    %c0_i32_0 = arith.constant 0 : i32
    %c0_i32_1 = arith.constant 0 : i32
    return %c0_i32, %c0_i32_0 : i32, i32
  }
  func.func @transform_7(%arg0: i32) -> (i32, i32) {
    %c0_i32 = arith.constant 0 : i32
    %c0_i32_0 = arith.constant 0 : i32
    %c0_i32_1 = arith.constant 0 : i32
    return %c0_i32, %c0_i32_0 : i32, i32
  }
  func.func @transform_8(%arg0: i32) -> (i32, i32) {
    %c0_i32 = arith.constant 0 : i32
    %c0_i32_0 = arith.constant 0 : i32
    %c0_i32_1 = arith.constant 0 : i32
    return %c0_i32, %c0_i32_0 : i32, i32
  }
  func.func @transform_9(%arg0: i32) -> (i32, i32) {
    %c0_i32 = arith.constant 0 : i32
    %c0_i32_0 = arith.constant 0 : i32
    %c0_i32_1 = arith.constant 0 : i32
    return %c0_i32, %c0_i32_0 : i32, i32
  }
  func.func @transform_10(%arg0: i32) -> (i32, i32) {
    %c0_i32 = arith.constant 0 : i32
    %c0_i32_0 = arith.constant 0 : i32
    %c0_i32_1 = arith.constant 0 : i32
    return %c0_i32, %c0_i32_0 : i32, i32
  }
  func.func @transform_11(%arg0: i32) -> (i32, i32) {
    %c0_i32 = arith.constant 0 : i32
    %c0_i32_0 = arith.constant 0 : i32
    return %arg0, %c0_i32 : i32, i32
  }
}

</mosaic_0001>

<bundles_post_ra>
// kernel: tpu_custom_call.1
= control target key start
LH: loop header
LB: loop body
LE: loop exit
PB: predicated region body
PF: predicated region fallthrough
CT: control target
= control target key end

     0   :  { %16 = vsyncpa [#allocation3], 0  ;;  %s691_s0 = inlined_call_operand.hbm [shape: f32[8,32], index: 0, kind: input, shape index: {}]   ;;  %s692_s1 = inlined_call_operand.hbm [shape: f32[8,32], index: 1, kind: input, shape index: {}]   ;;  %s693_s2 = inlined_call_operand.hbm [shape: f32[32,128], index: 2, kind: input, shape index: {}]   ;;  %s694_s3 = inlined_call_operand.hbm [shape: f32[32,128], index: 3, kind: input, shape index: {}]   ;;  %s695_s4 = inlined_call_operand.vmem [shape: f32[1,128], index: 4, kind: input, shape index: {}]   ;;  %s696_s5 = inlined_call_operand.hbm [shape: f32[128,128], index: 5, kind: input, shape index: {}]   ;;  %s697_s6 = inlined_call_operand.vmem [shape: f32[1,128], index: 6, kind: input, shape index: {}]   ;;  %s698_s7 = inlined_call_operand.hbm [shape: f32[128,128], index: 7, kind: input, shape index: {}]   ;;  %s699_s8 = inlined_call_operand.vmem [shape: f32[1,128], index: 8, kind: input, shape index: {}]   ;;  %s700_s9 = inlined_call_operand.hbm [shape: f32[128,128], index: 9, kind: input, shape index: {}]   ;;  %s701_s10 = inlined_call_operand.vmem [shape: f32[1,128], index: 10, kind: input, shape index: {}]   ;;  %s702_s11 = inlined_call_operand.hbm [shape: f32[8,128], index: 11, kind: output, shape index: {}]  }
   0x1   :  { %17 = vsyncpa [#allocation6], 0 }
   0x2   :  { %18 = vsyncpa [#allocation9], 0 }
   0x3   :  { %19 = vsyncpa [#allocation12], 0  ;;  %s37_s19 = sshll.u32 %s692_s1, 4  ;;  %s38_s19 = int_to_ptr.hbm [resolvable:$true] %s37_s19 }
   0x4   :  { %20 = vsyncpa [#allocation4], 0  ;;  %s568_s20 = smov [#allocation5]   ;;  %s60_s24 = sshll.u32 %s694_s3, 4  ;;  %s61_s24 = int_to_ptr.hbm [resolvable:$true] %s60_s24 }
   0x5   :  { %s39_s21 = sshll.u32 %s568_s20, 4  ;;  %s569_s25 = smov [#allocation8]   ;;  %s40_s21 = int_to_ptr.vmem [resolvable:$true] %s39_s21 }
   0x6   :  { %42 = dma.hbm_to_vmem [thread:$0]  %s38_s19, 128, %s40_s21, [#allocation6]  }
   0x7   :  { %s62_s26 = sshll.u32 %s569_s25, 4  ;;  %s90_s29 = sshll.u32 %s698_s7, 4  ;;  %s63_s26 = int_to_ptr.vmem [resolvable:$true] %s62_s26  ;;  %s91_s29 = int_to_ptr.hbm [resolvable:$true] %s90_s29 }
   0x8   :  { %s570_s1 = smov 128   ;;  %s571_s30 = smov 8  }
   0x9   :  { %68 = dma.hbm_to_vmem [thread:$0]  %s61_s24, 512, %s63_s26, [#allocation9], %s570_s1, %s570_s1, %s571_s30  }
   0xa   :  { %s26_s14 = sshll.u32 %s691_s0, 4  ;;  %s572_s3 = smov [#allocation11]   ;;  %s27_s14 = int_to_ptr.hbm [resolvable:$true] %s26_s14 }
   0xb   :  { %s92_s15 = sshll.u32 %s572_s3, 4  ;;  %s573_s7 = smov [#allocation2]   ;;  %s93_s15 = int_to_ptr.vmem [resolvable:$true] %s92_s15 }
   0xc   :  { %98 = dma.hbm_to_vmem [thread:$0]  %s91_s29, 2048, %s93_s15, [#allocation12], %s570_s1, %s570_s1, %s571_s30  }
   0xd   :  { %s28_s16 = sshll.u32 %s573_s7, 4  ;;  %s47_s19 = sshll.u32 %s693_s2, 4  ;;  %s29_s16 = int_to_ptr.vmem [resolvable:$true] %s28_s16  ;;  %s48_s19 = int_to_ptr.hbm [resolvable:$true] %s47_s19 }
   0xe   :  { %31 = dma.hbm_to_vmem [thread:$0]  %s27_s14, 128, %s29_s16, [#allocation3]  }
   0xf   :  { %s75_s0 = sshll.u32 %s696_s5, 4  ;;  %s574_s22 = smov [#allocation7]   ;;  %s76_s0 = int_to_ptr.hbm [resolvable:$true] %s75_s0 }
  0x10   :  { %s49_s23 = sshll.u32 %s574_s22, 4  ;;  %s575_s24 = smov [#allocation10]   ;;  %s50_s23 = int_to_ptr.vmem [resolvable:$true] %s49_s23 }
  0x11   :  { %55 = dma.hbm_to_vmem [thread:$0]  %s48_s19, 512, %s50_s23, [#allocation6], %s570_s1, %s570_s1, %s571_s30  }
  0x12   :  { %s77_s25 = sshll.u32 %s575_s24, 4  ;;  %s105_s2 = sshll.u32 %s700_s9, 4  ;;  %s78_s25 = int_to_ptr.vmem [resolvable:$true] %s77_s25  ;;  %s106_s2 = int_to_ptr.hbm [resolvable:$true] %s105_s2 }
  0x13   :  { %83 = dma.hbm_to_vmem [thread:$0]  %s76_s0, 2048, %s78_s25, [#allocation9], %s570_s1, %s570_s1, %s571_s30  }
  0x14   :  { %s576_s5 = smov [#allocation13]  }
  0x15   :  { %s107_s28 = sshll.u32 %s576_s5, 4  ;;  %s108_s28 = int_to_ptr.vmem [resolvable:$true] %s107_s28 }
  0x16   :  { %113 = dma.hbm_to_vmem [thread:$0]  %s106_s2, 2048, %s108_s28, [#allocation12], %s570_s1, %s570_s1, %s571_s30  }
  0x17   :  { %558 = dma.done.wait [#allocation3], 128  }
  0x18   :  { %559 = vsyncadd [#allocation3], 4294967168 }
  0x19   :  { %560 = dma.done.wait [#allocation6], 640  }
  0x1a   :  { %561 = vsyncadd [#allocation6], 4294966656 }
  0x1b   :  { %562 = dma.done.wait [#allocation9], 2560  }
  0x1c   :  { %563 = vsyncadd [#allocation9], 4294964736 }
  0x1d   :  { %564 = dma.done.wait [#allocation12], 4096  }
  0x1e   :  { %565 = vsyncadd [#allocation12], 4294963200  ;;  %v153_v0 = vld [vmem:[#allocation8 + $0x18] sm:$0xff]  ;;  %v152_v1 = vld [vmem:[#allocation8 + $0x10] sm:$0xff]  ;;  %vm154_vm0 = vcmask 261120   ;;  %s577_s14 = smov [#allocation14]  }
  0x1f   :  { %170 = vmatpush.msra.mxu1 %v153_v0  ;;  %v151_v2 = vld [vmem:[#allocation8 + $0x8] sm:$0xff]  ;;  %v222_v3 = vld [vmem:[#allocation10 + $0x78] sm:$0xff]  ;;  %v221_v4 = vld [vmem:[#allocation10 + $0x70] sm:$0xff]  ;;  %s335_s3 = sshll.u32 %s577_s14, 4  ;;  %s337_s16 = sshll.u32 %s702_s11, 4  ;;  %s336_s3 = int_to_ptr.vmem [resolvable:$true] %s335_s3  ;;  %s338_s16 = int_to_ptr.hbm [resolvable:$true] %s337_s16 }
  0x20   :  { %v150_v5 = vld [vmem:[#allocation8] sm:$0xff]  ;;  %227 = vmatpush.msra.mxu2 %v222_v3  ;;  %v149_v6 = vld [vmem:[#allocation5] sm:$0xff]  ;;  %v220_v8 = vld [vmem:[#allocation10 + $0x68] sm:$0xff] }
  0x21   :  { %171 = vmatpush.msra.mxu1 %v152_v1  ;;  %v148_v7 = vld [vmem:[#allocation7 + $0x18] sm:$0xff]  ;;  %v219_v9 = vld [vmem:[#allocation10 + $0x60] sm:$0xff]  ;;  %v147_v10 = vld [vmem:[#allocation7 + $0x10] sm:$0xff] }
  0x22   :  { %228 = vmatpush.msra.mxu2 %v221_v4  ;;  %v218_v11 = vld [vmem:[#allocation10 + $0x58] sm:$0xff]  ;;  %v146_v12 = vld [vmem:[#allocation7 + $0x8] sm:$0xff]  ;;  %v217_v13 = vld [vmem:[#allocation10 + $0x50] sm:$0xff] }
  0x23   :  { %172 = vmatpush.msra.mxu1 %v151_v2  ;;  %v145_v14 = vld [vmem:[#allocation7] sm:$0xff]  ;;  %v144_v15 = vld [vmem:[#allocation2] sm:$0xff]  ;;  %v216_v16 = vld [vmem:[#allocation10 + $0x48] sm:$0xff] }
  0x24   :  { %229 = vmatpush.msra.mxu2 %v220_v8  ;;  %v215_v17 = vld [vmem:[#allocation10 + $0x40] sm:$0xff]  ;;  %v214_v18 = vld [vmem:[#allocation10 + $0x38] sm:$0xff]  ;;  %v213_v19 = vld [vmem:[#allocation10 + $0x30] sm:$0xff] }
  0x25   :  { %173 = vmatpush.msra.mxu1 %v150_v5  ;;  %v212_v20 = vld [vmem:[#allocation10 + $0x28] sm:$0xff]  ;;  %v211_v21 = vld [vmem:[#allocation10 + $0x20] sm:$0xff]  ;;  %v210_v22 = vld [vmem:[#allocation10 + $0x18] sm:$0xff] }
  0x26   :  { %350 = vmatmul.msk.f32.vlgmr.msra.gmra.mxu1 %vm154_vm0, %v149_v6  ;;  %230 = vmatpush.msra.mxu2 %v219_v9  ;;  %v209_v23 = vld [vmem:[#allocation10 + $0x10] sm:$0xff]  ;;  %v208_v24 = vld [vmem:[#allocation10 + $0x8] sm:$0xff]  ;;  %v207_v25 = vld [vmem:[#allocation10] sm:$0xff] }
  0x27   :  { %193 = vmatpush.msrb.mxu1 %v148_v7  ;;  %v263_v26 = vld [vmem:[#allocation11 + $0x78] sm:$0xff]  ;;  %v262_v27 = vld [vmem:[#allocation11 + $0x70] sm:$0xff]  ;;  %v261_v28 = vld [vmem:[#allocation11 + $0x68] sm:$0xff] }
  0x28   :  { %231 = vmatpush.msra.mxu2 %v218_v11  ;;  %268 = vmatpush.msra.mxu3 %v263_v26  ;;  %v260_v29 = vld [vmem:[#allocation11 + $0x60] sm:$0xff]  ;;  %v259_v30 = vld [vmem:[#allocation11 + $0x58] sm:$0xff]  ;;  %v258_v31 = vld [vmem:[#allocation11 + $0x50] sm:$0xff] }
  0x29   :  { %194 = vmatpush.msrb.mxu1 %v147_v10  ;;  %v257_v32 = vld [vmem:[#allocation11 + $0x48] sm:$0xff]  ;;  %v256_v33 = vld [vmem:[#allocation11 + $0x40] sm:$0xff]  ;;  %v255_v34 = vld [vmem:[#allocation11 + $0x38] sm:$0xff] }
  0x2a   :  { %232 = vmatpush.msra.mxu2 %v217_v13  ;;  %269 = vmatpush.msra.mxu3 %v262_v27  ;;  %v254_v35 = vld [vmem:[#allocation11 + $0x30] sm:$0xff]  ;;  %v253_v37 = vld [vmem:[#allocation11 + $0x28] sm:$0xff]  ;;  %v252_v38 = vld [vmem:[#allocation11 + $0x20] sm:$0xff] }
  0x2b   :  { %195 = vmatpush.msrb.mxu1 %v146_v12  ;;  %v251_v39 = vld [vmem:[#allocation11 + $0x18] sm:$0xff]  ;;  %v362_v40 = vld [vmem:[%s695_s4] ss:$0 sm:$0xff]  ;;  %v249_v46 = vld [vmem:[#allocation11 + $0x8] sm:$0xff] }
  0x2c   :  { %233 = vmatpush.msra.mxu2 %v216_v16  ;;  %270 = vmatpush.msra.mxu3 %v261_v28  ;;  %v250_v45 = vld [vmem:[#allocation11 + $0x10] sm:$0xff]  ;;  %v248_v47 = vld [vmem:[#allocation11] sm:$0xff]  ;;  %v304_v48 = vld [vmem:[#allocation13 + $0x78] sm:$0xff] }
  0x2d   :  { %196 = vmatpush.msrb.mxu1 %v145_v14  ;;  %v303_v49 = vld [vmem:[#allocation13 + $0x70] sm:$0xff]  ;;  %309 = vmatpush.msra.mxu0 %v304_v48  ;;  %v302_v50 = vld [vmem:[#allocation13 + $0x68] sm:$0xff]  ;;  %v301_v51 = vld [vmem:[#allocation13 + $0x60] sm:$0xff] }
  0x2e   :  { %351 = vmatmul.msk.f32.vlgmr.msrb.gmra.mxu1 %vm154_vm0, %v144_v15  ;;  %234 = vmatpush.msra.mxu2 %v215_v17  ;;  %v300_v52 = vld [vmem:[#allocation13 + $0x58] sm:$0xff]  ;;  %v299_v53 = vld [vmem:[#allocation13 + $0x50] sm:$0xff]  ;;  %v298_v54 = vld [vmem:[#allocation13 + $0x48] sm:$0xff] }
  0x2f   :  { %271 = vmatpush.msra.mxu3 %v260_v29  ;;  %310 = vmatpush.msra.mxu0 %v303_v49  ;;  %v297_v55 = vld [vmem:[#allocation13 + $0x40] sm:$0xff]  ;;  %v296_v56 = vld [vmem:[#allocation13 + $0x38] sm:$0xff]  ;;  %v295_v57 = vld [vmem:[#allocation13 + $0x30] sm:$0xff] }
  0x30   :  { %235 = vmatpush.msra.mxu2 %v214_v18  ;;  %v294_v58 = vld [vmem:[#allocation13 + $0x28] sm:$0xff]  ;;  %v293_v59 = vld [vmem:[#allocation13 + $0x20] sm:$0xff]  ;;  %v292_v60 = vld [vmem:[#allocation13 + $0x18] sm:$0xff] }
  0x31   :  { %272 = vmatpush.msra.mxu3 %v259_v30  ;;  %311 = vmatpush.msra.mxu0 %v302_v50  ;;  %v363_v61 = vld [vmem:[%s697_s6] ss:$0 sm:$0xff]  ;;  %v290_v2 = vld [vmem:[#allocation13 + $0x8] sm:$0xff]  ;;  %v289_v3 = vld [vmem:[#allocation13] sm:$0xff] }
  0x32   :  { %236 = vmatpush.msra.mxu2 %v213_v19  ;;  %v291_v1 = vld [vmem:[#allocation13 + $0x10] sm:$0xff] }
  0x33   :  { %273 = vmatpush.msra.mxu3 %v258_v31  ;;  %312 = vmatpush.msra.mxu0 %v301_v51  ;;  %v364_v4 = vld [vmem:[%s699_s8] ss:$0 sm:$0xff] }
  0x34   :  { %237 = vmatpush.msra.mxu2 %v212_v20  ;;  %v365_v8 = vld [vmem:[%s701_s10] ss:$0 sm:$0xff] }
  0x35   :  { %274 = vmatpush.msra.mxu3 %v257_v32  ;;  %313 = vmatpush.msra.mxu0 %v300_v52 }
  0x36   :  { %238 = vmatpush.msra.mxu2 %v211_v21 }
  0x37   :  { %275 = vmatpush.msra.mxu3 %v256_v33  ;;  %314 = vmatpush.msra.mxu0 %v299_v53 }
  0x38   :  { %239 = vmatpush.msra.mxu2 %v210_v22 }
  0x39   :  { %276 = vmatpush.msra.mxu3 %v255_v34  ;;  %315 = vmatpush.msra.mxu0 %v298_v54 }
  0x3a   :  { %240 = vmatpush.msra.mxu2 %v209_v23 }
  0x3b   :  { %277 = vmatpush.msra.mxu3 %v254_v35  ;;  %316 = vmatpush.msra.mxu0 %v297_v55 }
  0x3c   :  { %241 = vmatpush.msra.mxu2 %v208_v24 }
  0x3d   :  { %278 = vmatpush.msra.mxu3 %v253_v37  ;;  %317 = vmatpush.msra.mxu0 %v296_v56 }
  0x3e   :  { %242 = vmatpush.msra.mxu2 %v207_v25 }
  0x3f   :  { %279 = vmatpush.msra.mxu3 %v252_v38  ;;  %318 = vmatpush.msra.mxu0 %v295_v57 }
  0x41   :  { %280 = vmatpush.msra.mxu3 %v251_v39  ;;  %319 = vmatpush.msra.mxu0 %v294_v58 }
  0x43   :  { %281 = vmatpush.msra.mxu3 %v250_v45  ;;  %320 = vmatpush.msra.mxu0 %v293_v59 }
  0x45   :  { %282 = vmatpush.msra.mxu3 %v249_v46  ;;  %321 = vmatpush.msra.mxu0 %v292_v60 }
  0x47   :  { %283 = vmatpush.msra.mxu3 %v248_v47  ;;  %322 = vmatpush.msra.mxu0 %v291_v1 }
  0x49   :  { %323 = vmatpush.msra.mxu0 %v290_v2 }
  0x4b   :  { %324 = vmatpush.msra.mxu0 %v289_v3 }
  0xa3   :  { %v175_v36 = vpop.f32.mrf.mxu1 }
  0xab   :  { %v198_v41 = vpop.f32.mrf.mxu1 }
  0xac   :  { %v199_v42 = vadd.f32 %v198_v41, %v175_v36 }
  0xae   :  { %v205_v43 = vadd.f32 %v362_v40, %v199_v42 }
  0xb0   :  { %v206_v44 = vmax.f32 %v205_v43, 0.0 }
  0xb2   :  { %243 = vmatmul.f32.vlgmr.msra.gmra.mxu2 %v206_v44 }
 0x135   :  { %v244_v62 = vpop.f32.mrf.mxu2 }
 0x136   :  { %v245_v63 = vadd.f32 %v363_v61, %v244_v62 }
 0x138   :  { %v247_v0 = vmax.f32 %v245_v63, 0.0 }
 0x13a   :  { %284 = vmatmul.f32.vlgmr.msra.gmra.mxu3 %v247_v0 }
 0x1bd   :  { %v285_v5 = vpop.f32.mrf.mxu3 }
 0x1be   :  { %v286_v6 = vadd.f32 %v364_v4, %v285_v5 }
 0x1c0   :  { %v288_v7 = vmax.f32 %v286_v6, 0.0 }
 0x1c2   :  { %325 = vmatmul.f32.vlgmr.msra.gmra.mxu0 %v288_v7 }
 0x23f   :  { %v326_v9 = vpop.f32.mrf.mxu0 }
 0x240   :  { %v327_v10 = vadd.f32 %v365_v8, %v326_v9 }
 0x242   :  { %329 = vst [vmem:[#allocation14] sm:$0xff] %v327_v10 }
 0x243   :  { %340 = dma.vmem_to_hbm [thread:$0]  %s336_s3, 128, %s338_s16, [#allocation4]  }
 0x244   :  { %566 = dma.done.wait [#allocation4], 128  }
 0x245   :  { %567 = vsyncadd [#allocation4], 4294967168 }
 0x246   :  { %345 = vsyncpa [#allocation3], 1 }
 0x247   :  { %346 = vsyncpa [#allocation6], 1 }
 0x248   :  { %347 = vsyncpa [#allocation9], 1 }
 0x249   :  { %348 = vsyncpa [#allocation12], 1 }
 0x24a   :  { %349 = vsyncpa [#allocation4], 1 }

// kernel: tpu_custom_call.1
= control target key start
LH: loop header
LB: loop body
LE: loop exit
PB: predicated region body
PF: predicated region fallthrough
CT: control target
= control target key end

     0   :  { %16 = vsyncpa [#allocation3], 0  ;;  %s691_s0 = inlined_call_operand.hbm [shape: f32[8,32], index: 0, kind: input, shape index: {}]   ;;  %s692_s1 = inlined_call_operand.hbm [shape: f32[8,32], index: 1, kind: input, shape index: {}]   ;;  %s693_s2 = inlined_call_operand.hbm [shape: f32[32,128], index: 2, kind: input, shape index: {}]   ;;  %s694_s3 = inlined_call_operand.hbm [shape: f32[32,128], index: 3, kind: input, shape index: {}]   ;;  %s695_s4 = inlined_call_operand.vmem [shape: f32[1,128], index: 4, kind: input, shape index: {}]   ;;  %s696_s5 = inlined_call_operand.hbm [shape: f32[128,128], index: 5, kind: input, shape index: {}]   ;;  %s697_s6 = inlined_call_operand.vmem [shape: f32[1,128], index: 6, kind: input, shape index: {}]   ;;  %s698_s7 = inlined_call_operand.hbm [shape: f32[128,128], index: 7, kind: input, shape index: {}]   ;;  %s699_s8 = inlined_call_operand.vmem [shape: f32[1,128], index: 8, kind: input, shape index: {}]   ;;  %s700_s9 = inlined_call_operand.hbm [shape: f32[128,128], index: 9, kind: input, shape index: {}]   ;;  %s701_s10 = inlined_call_operand.vmem [shape: f32[1,128], index: 10, kind: input, shape index: {}]   ;;  %s702_s11 = inlined_call_operand.hbm [shape: f32[8,128], index: 11, kind: output, shape index: {}]  }
   0x1   :  { %17 = vsyncpa [#allocation6], 0 }
   0x2   :  { %18 = vsyncpa [#allocation9], 0 }
   0x3   :  { %19 = vsyncpa [#allocation12], 0  ;;  %s37_s19 = sshll.u32 %s692_s1, 4  ;;  %s38_s19 = int_to_ptr.hbm [resolvable:$true] %s37_s19 }
   0x4   :  { %20 = vsyncpa [#allocation4], 0  ;;  %s568_s20 = smov [#allocation5]   ;;  %s60_s24 = sshll.u32 %s694_s3, 4  ;;  %s61_s24 = int_to_ptr.hbm [resolvable:$true] %s60_s24 }
   0x5   :  { %s39_s21 = sshll.u32 %s568_s20, 4  ;;  %s569_s25 = smov [#allocation8]   ;;  %s40_s21 = int_to_ptr.vmem [resolvable:$true] %s39_s21 }
   0x6   :  { %42 = dma.hbm_to_vmem [thread:$0]  %s38_s19, 128, %s40_s21, [#allocation6]  }
   0x7   :  { %s62_s26 = sshll.u32 %s569_s25, 4  ;;  %s90_s29 = sshll.u32 %s698_s7, 4  ;;  %s63_s26 = int_to_ptr.vmem [resolvable:$true] %s62_s26  ;;  %s91_s29 = int_to_ptr.hbm [resolvable:$true] %s90_s29 }
   0x8   :  { %s570_s1 = smov 128   ;;  %s571_s30 = smov 8  }
   0x9   :  { %68 = dma.hbm_to_vmem [thread:$0]  %s61_s24, 512, %s63_s26, [#allocation9], %s570_s1, %s570_s1, %s571_s30  }
   0xa   :  { %s26_s14 = sshll.u32 %s691_s0, 4  ;;  %s572_s3 = smov [#allocation11]   ;;  %s27_s14 = int_to_ptr.hbm [resolvable:$true] %s26_s14 }
   0xb   :  { %s92_s15 = sshll.u32 %s572_s3, 4  ;;  %s573_s7 = smov [#allocation2]   ;;  %s93_s15 = int_to_ptr.vmem [resolvable:$true] %s92_s15 }
   0xc   :  { %98 = dma.hbm_to_vmem [thread:$0]  %s91_s29, 2048, %s93_s15, [#allocation12], %s570_s1, %s570_s1, %s571_s30  }
   0xd   :  { %s28_s16 = sshll.u32 %s573_s7, 4  ;;  %s47_s19 = sshll.u32 %s693_s2, 4  ;;  %s29_s16 = int_to_ptr.vmem [resolvable:$true] %s28_s16  ;;  %s48_s19 = int_to_ptr.hbm [resolvable:$true] %s47_s19 }
   0xe   :  { %31 = dma.hbm_to_vmem [thread:$0]  %s27_s14, 128, %s29_s16, [#allocation3]  }
   0xf   :  { %s75_s0 = sshll.u32 %s696_s5, 4  ;;  %s574_s22 = smov [#allocation7]   ;;  %s76_s0 = int_to_ptr.hbm [resolvable:$true] %s75_s0 }
  0x10   :  { %s49_s23 = sshll.u32 %s574_s22, 4  ;;  %s575_s24 = smov [#allocation10]   ;;  %s50_s23 = int_to_ptr.vmem [resolvable:$true] %s49_s23 }
  0x11   :  { %55 = dma.hbm_to_vmem [thread:$0]  %s48_s19, 512, %s50_s23, [#allocation6], %s570_s1, %s570_s1, %s571_s30  }
  0x12   :  { %s77_s25 = sshll.u32 %s575_s24, 4  ;;  %s105_s2 = sshll.u32 %s700_s9, 4  ;;  %s78_s25 = int_to_ptr.vmem [resolvable:$true] %s77_s25  ;;  %s106_s2 = int_to_ptr.hbm [resolvable:$true] %s105_s2 }
  0x13   :  { %83 = dma.hbm_to_vmem [thread:$0]  %s76_s0, 2048, %s78_s25, [#allocation9], %s570_s1, %s570_s1, %s571_s30  }
  0x14   :  { %s576_s5 = smov [#allocation13]  }
  0x15   :  { %s107_s28 = sshll.u32 %s576_s5, 4  ;;  %s108_s28 = int_to_ptr.vmem [resolvable:$true] %s107_s28 }
  0x16   :  { %113 = dma.hbm_to_vmem [thread:$0]  %s106_s2, 2048, %s108_s28, [#allocation12], %s570_s1, %s570_s1, %s571_s30  }
  0x17   :  { %558 = dma.done.wait [#allocation3], 128  }
  0x18   :  { %559 = vsyncadd [#allocation3], 4294967168 }
  0x19   :  { %560 = dma.done.wait [#allocation6], 640  }
  0x1a   :  { %561 = vsyncadd [#allocation6], 4294966656 }
  0x1b   :  { %562 = dma.done.wait [#allocation9], 2560  }
  0x1c   :  { %563 = vsyncadd [#allocation9], 4294964736 }
  0x1d   :  { %564 = dma.done.wait [#allocation12], 4096  }
  0x1e   :  { %565 = vsyncadd [#allocation12], 4294963200  ;;  %v153_v0 = vld [vmem:[#allocation8 + $0x18] sm:$0xff]  ;;  %v152_v1 = vld [vmem:[#allocation8 + $0x10] sm:$0xff]  ;;  %vm154_vm0 = vcmask 261120   ;;  %s577_s14 = smov [#allocation14]  }
  0x1f   :  { %170 = vmatpush.msra.mxu1 %v153_v0  ;;  %v151_v2 = vld [vmem:[#allocation8 + $0x8] sm:$0xff]  ;;  %v222_v3 = vld [vmem:[#allocation10 + $0x78] sm:$0xff]  ;;  %v221_v4 = vld [vmem:[#allocation10 + $0x70] sm:$0xff]  ;;  %s335_s3 = sshll.u32 %s577_s14, 4  ;;  %s337_s16 = sshll.u32 %s702_s11, 4  ;;  %s336_s3 = int_to_ptr.vmem [resolvable:$true] %s335_s3  ;;  %s338_s16 = int_to_ptr.hbm [resolvable:$true] %s337_s16 }
  0x20   :  { %v150_v5 = vld [vmem:[#allocation8] sm:$0xff]  ;;  %227 = vmatpush.msra.mxu2 %v222_v3  ;;  %v149_v6 = vld [vmem:[#allocation5] sm:$0xff]  ;;  %v220_v8 = vld [vmem:[#allocation10 + $0x68] sm:$0xff] }
  0x21   :  { %171 = vmatpush.msra.mxu1 %v152_v1  ;;  %v148_v7 = vld [vmem:[#allocation7 + $0x18] sm:$0xff]  ;;  %v219_v9 = vld [vmem:[#allocation10 + $0x60] sm:$0xff]  ;;  %v147_v10 = vld [vmem:[#allocation7 + $0x10] sm:$0xff] }
  0x22   :  { %228 = vmatpush.msra.mxu2 %v221_v4  ;;  %v218_v11 = vld [vmem:[#allocation10 + $0x58] sm:$0xff]  ;;  %v146_v12 = vld [vmem:[#allocation7 + $0x8] sm:$0xff]  ;;  %v217_v13 = vld [vmem:[#allocation10 + $0x50] sm:$0xff] }
  0x23   :  { %172 = vmatpush.msra.mxu1 %v151_v2  ;;  %v145_v14 = vld [vmem:[#allocation7] sm:$0xff]  ;;  %v144_v15 = vld [vmem:[#allocation2] sm:$0xff]  ;;  %v216_v16 = vld [vmem:[#allocation10 + $0x48] sm:$0xff] }
  0x24   :  { %229 = vmatpush.msra.mxu2 %v220_v8  ;;  %v215_v17 = vld [vmem:[#allocation10 + $0x40] sm:$0xff]  ;;  %v214_v18 = vld [vmem:[#allocation10 + $0x38] sm:$0xff]  ;;  %v213_v19 = vld [vmem:[#allocation10 + $0x30] sm:$0xff] }
  0x25   :  { %173 = vmatpush.msra.mxu1 %v150_v5  ;;  %v212_v20 = vld [vmem:[#allocation10 + $0x28] sm:$0xff]  ;;  %v211_v21 = vld [vmem:[#allocation10 + $0x20] sm:$0xff]  ;;  %v210_v22 = vld [vmem:[#allocation10 + $0x18] sm:$0xff] }
  0x26   :  { %350 = vmatmul.msk.f32.vlgmr.msra.gmra.mxu1 %vm154_vm0, %v149_v6  ;;  %230 = vmatpush.msra.mxu2 %v219_v9  ;;  %v209_v23 = vld [vmem:[#allocation10 + $0x10] sm:$0xff]  ;;  %v208_v24 = vld [vmem:[#allocation10 + $0x8] sm:$0xff]  ;;  %v207_v25 = vld [vmem:[#allocation10] sm:$0xff] }
  0x27   :  { %193 = vmatpush.msrb.mxu1 %v148_v7  ;;  %v263_v26 = vld [vmem:[#allocation11 + $0x78] sm:$0xff]  ;;  %v262_v27 = vld [vmem:[#allocation11 + $0x70] sm:$0xff]  ;;  %v261_v28 = vld [vmem:[#allocation11 + $0x68] sm:$0xff] }
  0x28   :  { %231 = vmatpush.msra.mxu2 %v218_v11  ;;  %268 = vmatpush.msra.mxu3 %v263_v26  ;;  %v260_v29 = vld [vmem:[#allocation11 + $0x60] sm:$0xff]  ;;  %v259_v30 = vld [vmem:[#allocation11 + $0x58] sm:$0xff]  ;;  %v258_v31 = vld [vmem:[#allocation11 + $0x50] sm:$0xff] }
  0x29   :  { %194 = vmatpush.msrb.mxu1 %v147_v10  ;;  %v257_v32 = vld [vmem:[#allocation11 + $0x48] sm:$0xff]  ;;  %v256_v33 = vld [vmem:[#allocation11 + $0x40] sm:$0xff]  ;;  %v255_v34 = vld [vmem:[#allocation11 + $0x38] sm:$0xff] }
  0x2a   :  { %232 = vmatpush.msra.mxu2 %v217_v13  ;;  %269 = vmatpush.msra.mxu3 %v262_v27  ;;  %v254_v35 = vld [vmem:[#allocation11 + $0x30] sm:$0xff]  ;;  %v253_v37 = vld [vmem:[#allocation11 + $0x28] sm:$0xff]  ;;  %v252_v38 = vld [vmem:[#allocation11 + $0x20] sm:$0xff] }
  0x2b   :  { %195 = vmatpush.msrb.mxu1 %v146_v12  ;;  %v251_v39 = vld [vmem:[#allocation11 + $0x18] sm:$0xff]  ;;  %v362_v40 = vld [vmem:[%s695_s4] ss:$0 sm:$0xff]  ;;  %v249_v46 = vld [vmem:[#allocation11 + $0x8] sm:$0xff] }
  0x2c   :  { %233 = vmatpush.msra.mxu2 %v216_v16  ;;  %270 = vmatpush.msra.mxu3 %v261_v28  ;;  %v250_v45 = vld [vmem:[#allocation11 + $0x10] sm:$0xff]  ;;  %v248_v47 = vld [vmem:[#allocation11] sm:$0xff]  ;;  %v304_v48 = vld [vmem:[#allocation13 + $0x78] sm:$0xff] }
  0x2d   :  { %196 = vmatpush.msrb.mxu1 %v145_v14  ;;  %v303_v49 = vld [vmem:[#allocation13 + $0x70] sm:$0xff]  ;;  %309 = vmatpush.msra.mxu0 %v304_v48  ;;  %v302_v50 = vld [vmem:[#allocation13 + $0x68] sm:$0xff]  ;;  %v301_v51 = vld [vmem:[#allocation13 + $0x60] sm:$0xff] }
  0x2e   :  { %351 = vmatmul.msk.f32.vlgmr.msrb.gmra.mxu1 %vm154_vm0, %v144_v15  ;;  %234 = vmatpush.msra.mxu2 %v215_v17  ;;  %v300_v52 = vld [vmem:[#allocation13 + $0x58] sm:$0xff]  ;;  %v299_v53 = vld [vmem:[#allocation13 + $0x50] sm:$0xff]  ;;  %v298_v54 = vld [vmem:[#allocation13 + $0x48] sm:$0xff] }
  0x2f   :  { %271 = vmatpush.msra.mxu3 %v260_v29  ;;  %310 = vmatpush.msra.mxu0 %v303_v49  ;;  %v297_v55 = vld [vmem:[#allocation13 + $0x40] sm:$0xff]  ;;  %v296_v56 = vld [vmem:[#allocation13 + $0x38] sm:$0xff]  ;;  %v295_v57 = vld [vmem:[#allocation13 + $0x30] sm:$0xff] }
  0x30   :  { %235 = vmatpush.msra.mxu2 %v214_v18  ;;  %v294_v58 = vld [vmem:[#allocation13 + $0x28] sm:$0xff]  ;;  %v293_v59 = vld [vmem:[#allocation13 + $0x20] sm:$0xff]  ;;  %v292_v60 = vld [vmem:[#allocation13 + $0x18] sm:$0xff] }
  0x31   :  { %272 = vmatpush.msra.mxu3 %v259_v30  ;;  %311 = vmatpush.msra.mxu0 %v302_v50  ;;  %v363_v61 = vld [vmem:[%s697_s6] ss:$0 sm:$0xff]  ;;  %v290_v2 = vld [vmem:[#allocation13 + $0x8] sm:$0xff]  ;;  %v289_v3 = vld [vmem:[#allocation13] sm:$0xff] }
  0x32   :  { %236 = vmatpush.msra.mxu2 %v213_v19  ;;  %v291_v1 = vld [vmem:[#allocation13 + $0x10] sm:$0xff] }
  0x33   :  { %273 = vmatpush.msra.mxu3 %v258_v31  ;;  %312 = vmatpush.msra.mxu0 %v301_v51  ;;  %v364_v4 = vld [vmem:[%s699_s8] ss:$0 sm:$0xff] }
  0x34   :  { %237 = vmatpush.msra.mxu2 %v212_v20  ;;  %v365_v8 = vld [vmem:[%s701_s10] ss:$0 sm:$0xff] }
  0x35   :  { %274 = vmatpush.msra.mxu3 %v257_v32  ;;  %313 = vmatpush.msra.mxu0 %v300_v52 }
  0x36   :  { %238 = vmatpush.msra.mxu2 %v211_v21 }
  0x37   :  { %275 = vmatpush.msra.mxu3 %v256_v33  ;;  %314 = vmatpush.msra.mxu0 %v299_v53 }
  0x38   :  { %239 = vmatpush.msra.mxu2 %v210_v22 }
  0x39   :  { %276 = vmatpush.msra.mxu3 %v255_v34  ;;  %315 = vmatpush.msra.mxu0 %v298_v54 }
  0x3a   :  { %240 = vmatpush.msra.mxu2 %v209_v23 }
  0x3b   :  { %277 = vmatpush.msra.mxu3 %v254_v35  ;;  %316 = vmatpush.msra.mxu0 %v297_v55 }
  0x3c   :  { %241 = vmatpush.msra.mxu2 %v208_v24 }
  0x3d   :  { %278 = vmatpush.msra.mxu3 %v253_v37  ;;  %317 = vmatpush.msra.mxu0 %v296_v56 }
  0x3e   :  { %242 = vmatpush.msra.mxu2 %v207_v25 }
  0x3f   :  { %279 = vmatpush.msra.mxu3 %v252_v38  ;;  %318 = vmatpush.msra.mxu0 %v295_v57 }
  0x41   :  { %280 = vmatpush.msra.mxu3 %v251_v39  ;;  %319 = vmatpush.msra.mxu0 %v294_v58 }
  0x43   :  { %281 = vmatpush.msra.mxu3 %v250_v45  ;;  %320 = vmatpush.msra.mxu0 %v293_v59 }
  0x45   :  { %282 = vmatpush.msra.mxu3 %v249_v46  ;;  %321 = vmatpush.msra.mxu0 %v292_v60 }
  0x47   :  { %283 = vmatpush.msra.mxu3 %v248_v47  ;;  %322 = vmatpush.msra.mxu0 %v291_v1 }
  0x49   :  { %323 = vmatpush.msra.mxu0 %v290_v2 }
  0x4b   :  { %324 = vmatpush.msra.mxu0 %v289_v3 }
  0xa3   :  { %v175_v36 = vpop.f32.mrf.mxu1 }
  0xab   :  { %v198_v41 = vpop.f32.mrf.mxu1 }
  0xac   :  { %v199_v42 = vadd.f32 %v198_v41, %v175_v36 }
  0xae   :  { %v205_v43 = vadd.f32 %v362_v40, %v199_v42 }
  0xb0   :  { %v206_v44 = vmax.f32 %v205_v43, 0.0 }
  0xb2   :  { %243 = vmatmul.f32.vlgmr.msra.gmra.mxu2 %v206_v44 }
 0x135   :  { %v244_v62 = vpop.f32.mrf.mxu2 }
 0x136   :  { %v245_v63 = vadd.f32 %v363_v61, %v244_v62 }
 0x138   :  { %v247_v0 = vmax.f32 %v245_v63, 0.0 }
 0x13a   :  { %284 = vmatmul.f32.vlgmr.msra.gmra.mxu3 %v247_v0 }
 0x1bd   :  { %v285_v5 = vpop.f32.mrf.mxu3 }
 0x1be   :  { %v286_v6 = vadd.f32 %v364_v4, %v285_v5 }
 0x1c0   :  { %v288_v7 = vmax.f32 %v286_v6, 0.0 }
 0x1c2   :  { %325 = vmatmul.f32.vlgmr.msra.gmra.mxu0 %v288_v7 }
 0x23f   :  { %v326_v9 = vpop.f32.mrf.mxu0 }
 0x240   :  { %v327_v10 = vadd.f32 %v365_v8, %v326_v9 }
 0x242   :  { %329 = vst [vmem:[#allocation14] sm:$0xff] %v327_v10 }
 0x243   :  { %340 = dma.vmem_to_hbm [thread:$0]  %s336_s3, 128, %s338_s16, [#allocation4]  }
 0x244   :  { %566 = dma.done.wait [#allocation4], 128  }
 0x245   :  { %567 = vsyncadd [#allocation4], 4294967168 }
 0x246   :  { %345 = vsyncpa [#allocation3], 1 }
 0x247   :  { %346 = vsyncpa [#allocation6], 1 }
 0x248   :  { %347 = vsyncpa [#allocation9], 1 }
 0x249   :  { %348 = vsyncpa [#allocation12], 1 }
 0x24a   :  { %349 = vsyncpa [#allocation4], 1 }

</bundles_post_ra>
